<compile_context>
chip_gen: v6e
topology: v6e:2x2x1
jax: 0.10.0
libtpu: 0.0.40
codegen_flags: <defaults>
</compile_context>

<pallas_src>
import functools

import jax
import jax.numpy as jnp
from jax.experimental import pallas as pl
from jax.experimental.pallas import tpu as pltpu

LANE = 128  # vreg lane width; q/k/v each occupy one full 128-lane slot (zero-padded).


def _attn_kernel(x_ref, wqkv_ref, bqkv_ref, o_ref, *,
                 batch: int, seq: int, inv_d_model: float):
    """Whole problem in one invocation (no grid).

    x_ref    : (B*S, D)      VMEM, compute dtype (bf16 or f32)
    wqkv_ref : (D, 3*128)    VMEM, compute dtype (Wq | Wk | Wv, each zero-padded to 128 lanes)
    bqkv_ref : (1, 3*128)    VMEM, f32            (bq | bk | bv, zero-padded)
    o_ref    : (B*S, 128)    VMEM, f32            (lane-dense; real output in lanes [0, dh))
    """
    cdt = x_ref.dtype

    # Fused QKV projection: one wide MXU matmul, f32 accumulation, f32 bias add.
    qkv = jnp.dot(x_ref[...], wqkv_ref[...],
                  preferred_element_type=jnp.float32) + bqkv_ref[...]
    qkv = qkv.reshape(batch, seq, 3 * LANE)

    # Whole-vreg lane slices (offsets 0 / 128 / 256). Pre-scale q by 1/d_model
    # (a power-of-two scale, exact in bf16); padded lanes stay exactly zero.
    q = (qkv[:, :, 0:LANE] * inv_d_model).astype(cdt)      # (B, S, 128)
    k = qkv[:, :, LANE:2 * LANE].astype(cdt)                # (B, S, 128)
    v = qkv[:, :, 2 * LANE:3 * LANE].astype(cdt)            # (B, S, 128)

    # scores = q @ k^T (batched, contracts the padded lane axis; zero padding is inert).
    s = jnp.einsum("bqd,bkd->bqk", q, k,
                   preferred_element_type=jnp.float32)      # (B, S, S) f32

    # Numerically-stable softmax over the last dim, all in f32, exact divide.
    m = s.max(axis=-1, keepdims=True)
    p = jnp.exp(s - m)
    p = p / p.sum(axis=-1, keepdims=True)

    # Attention output; dropout is identity (eval-mode semantics).
    out = jnp.einsum("bqk,bkd->bqd", p.astype(cdt), v,
                     preferred_element_type=jnp.float32)    # (B, S, 128) f32

    # Single unmasked whole-tile store (lane-dense output).
    o_ref[...] = out.reshape(batch * seq, LANE).astype(o_ref.dtype)


def attention_block(x, wq, bq, wk, bk, wv, bv, *, d_model: int,
                    compute_dtype=jnp.bfloat16):
    """x: (B, S, D).  w*: (D, dh).  b*: (1, dh).  Returns (B, S, dh) in x.dtype."""
    B, S, D = x.shape
    dh = wq.shape[1]
    assert dh <= LANE, "head dim larger than one vreg lane slot not supported here"

    pad = ((0, 0), (0, LANE - dh))
    # Fused, vreg-aligned projection weights/bias: lanes [0,128)=Q, [128,256)=K, [256,384)=V.
    wqkv = jnp.concatenate(
        [jnp.pad(wq, pad), jnp.pad(wk, pad), jnp.pad(wv, pad)], axis=1
    ).astype(compute_dtype)                                  # (D, 3*128)
    bqkv = jnp.concatenate(
        [jnp.pad(bq, pad), jnp.pad(bk, pad), jnp.pad(bv, pad)], axis=1
    ).astype(jnp.float32)                                    # (1, 3*128)

    # Fold batch into the matmul M dimension; MXU operands in compute_dtype.
    x2d = x.reshape(B * S, D).astype(compute_dtype)

    kernel = functools.partial(
        _attn_kernel, batch=B, seq=S, inv_d_model=1.0 / float(d_model))

    out2d = pl.pallas_call(
        kernel,
        out_shape=jax.ShapeDtypeStruct((B * S, LANE), x.dtype),
        # No grid: whole-array VMEM blocks, no pipelining / double-buffering overhead.
        in_specs=[
            pl.BlockSpec(memory_space=pltpu.MemorySpace.VMEM),   # x2d
            pl.BlockSpec(memory_space=pltpu.MemorySpace.VMEM),   # fused Wqkv
            pl.BlockSpec(memory_space=pltpu.MemorySpace.VMEM),   # fused bias
        ],
        out_specs=pl.BlockSpec(memory_space=pltpu.MemorySpace.VMEM),
    )(x2d, wqkv, bqkv)

    # Slice the real head dim back out of the lane-dense slab.
    return out2d[:, :dh].reshape(B, S, dh)


def _reference(x, wq, bq, wk, bk, wv, bv, d_model):
    q = x @ wq + bq
    k = x @ wk + bk
    v = x @ wv + bv
    s = jnp.einsum("bqd,bkd->bqk", q, k) / d_model
    p = jax.nn.softmax(s, axis=-1)
    return jnp.einsum("bqk,bkd->bqd", p, v)


if __name__ == "__main__":
    # Small shapes consistent with the module's forward:
    #   x: (batch=2, seq=8, d_model=32), num_heads=4 -> d_head = 8
    B, S, D = 2, 8, 32
    num_heads = 4
    dh = D // num_heads

    key = jax.random.PRNGKey(0)
    kx, kq, kk, kv, kbq, kbk, kbv = jax.random.split(key, 7)

    x = jax.random.normal(kx, (B, S, D), dtype=jnp.float32)

    # Deterministic parameter init (uniform like nn.Linear's default bound).
    bound = 1.0 / (D ** 0.5)
    wq = jax.random.uniform(kq, (D, dh), jnp.float32, -bound, bound)
    wk = jax.random.uniform(kk, (D, dh), jnp.float32, -bound, bound)
    wv = jax.random.uniform(kv, (D, dh), jnp.float32, -bound, bound)
    bq = jax.random.uniform(kbq, (1, dh), jnp.float32, -bound, bound)
    bk = jax.random.uniform(kbk, (1, dh), jnp.float32, -bound, bound)
    bv = jax.random.uniform(kbv, (1, dh), jnp.float32, -bound, bound)

    ref = _reference(x, wq, bq, wk, bk, wv, bv, float(D))

    # f32 MXU operands: tight parity with the reference (exact softmax divide).
    out_f32 = attention_block(x, wq, bq, wk, bk, wv, bv, d_model=D,
                              compute_dtype=jnp.float32)
    out_f32 = jax.block_until_ready(out_f32)
    assert out_f32.shape == (B, S, dh)
    assert jnp.allclose(out_f32, ref, atol=1e-5, rtol=1e-5)

    # bf16 MXU operands (default, per perf review): softmax stays f32, looser tolerance.
    out_bf16 = attention_block(x, wq, bq, wk, bk, wv, bv, d_model=D,
                               compute_dtype=jnp.bfloat16)
    out_bf16 = jax.block_until_ready(out_bf16)
    assert out_bf16.shape == (B, S, dh)
    assert jnp.allclose(out_bf16, ref, atol=2e-2, rtol=2e-2)

    print("KERNEL_OK")
</pallas_src>

<mosaic_0001>
module attributes {stable_mosaic.version = 11 : i64} {
  func.func @_attn_kernel(%arg0: memref<16x32xf32, #tpu.memory_space<vmem>>, %arg1: memref<32x384xf32, #tpu.memory_space<vmem>>, %arg2: memref<1x384xf32, #tpu.memory_space<vmem>>, %arg3: memref<16x128xf32, #tpu.memory_space<vmem>>) attributes {dimension_semantics = [], scalar_prefetch = 0 : i64, scratch_operands = 0 : i64, tpu.core_type = #tpu.core_type<tc>} {
    %c0 = arith.constant 0 : index
    %c0_0 = arith.constant 0 : index
    %0 = vector.load %arg0[%c0, %c0_0] : memref<16x32xf32, #tpu.memory_space<vmem>>, vector<16x32xf32>
    %c0_1 = arith.constant 0 : index
    %c0_2 = arith.constant 0 : index
    %1 = vector.load %arg1[%c0_1, %c0_2] : memref<32x384xf32, #tpu.memory_space<vmem>>, vector<32x384xf32>
    %cst = arith.constant dense<0.000000e+00> : vector<16x384xf32>
    %2 = tpu.matmul %0, %1, %cst {dimension_numbers = #tpu.dot_dimension_numbers<[1], [0], [0], [1], [0, 0, 1, 1], [], []>} : vector<16x32xf32>, vector<32x384xf32>, vector<16x384xf32> -> vector<16x384xf32>
    %c0_3 = arith.constant 0 : index
    %c0_4 = arith.constant 0 : index
    %3 = vector.load %arg2[%c0_3, %c0_4] : memref<1x384xf32, #tpu.memory_space<vmem>>, vector<1x384xf32>
    %4 = vector.broadcast %3 : vector<1x384xf32> to vector<16x384xf32>
    %5 = arith.addf %2, %4 : vector<16x384xf32>
    %6 = vector.shape_cast %5 : vector<16x384xf32> to vector<2x8x384xf32>
    %7 = vector.extract_strided_slice %6 {offsets = [0, 0, 0], sizes = [2, 8, 128], strides = [1, 1, 1]} : vector<2x8x384xf32> to vector<2x8x128xf32>
    %cst_5 = arith.constant 3.125000e-02 : f32
    %8 = vector.broadcast %cst_5 : f32 to vector<2x8x128xf32>
    %9 = arith.mulf %7, %8 : vector<2x8x128xf32>
    %10 = vector.extract_strided_slice %6 {offsets = [0, 0, 128], sizes = [2, 8, 128], strides = [1, 1, 1]} : vector<2x8x384xf32> to vector<2x8x128xf32>
    %11 = vector.extract_strided_slice %6 {offsets = [0, 0, 256], sizes = [2, 8, 128], strides = [1, 1, 1]} : vector<2x8x384xf32> to vector<2x8x128xf32>
    "tpu.trace_start"() <{level = 10 : i32, message = "bqd,bkd->bqk"}> : () -> ()
    %cst_6 = arith.constant dense<0.000000e+00> : vector<2x8x8xf32>
    %12 = tpu.matmul %9, %10, %cst_6 {dimension_numbers = #tpu.dot_dimension_numbers<[2], [2], [1], [1], [0, 0, 0, 1, 1, 1], [0], [0]>} : vector<2x8x128xf32>, vector<2x8x128xf32>, vector<2x8x8xf32> -> vector<2x8x8xf32>
    "tpu.trace_stop"() : () -> ()
    %cst_7 = arith.constant dense<0xFF800000> : vector<2x8xf32>
    %13 = vector.multi_reduction <maximumf>, %12, %cst_7 [2] : vector<2x8x8xf32> to vector<2x8xf32>
    %14 = vector.shape_cast %13 : vector<2x8xf32> to vector<2x8x1xf32>
    %15 = vector.broadcast %14 : vector<2x8x1xf32> to vector<2x8x8xf32>
    %16 = arith.subf %12, %15 : vector<2x8x8xf32>
    %17 = math.exp %16 : vector<2x8x8xf32>
    %cst_8 = arith.constant dense<0.000000e+00> : vector<2x8xf32>
    %18 = vector.multi_reduction <add>, %17, %cst_8 [2] : vector<2x8x8xf32> to vector<2x8xf32>
    %19 = vector.shape_cast %18 : vector<2x8xf32> to vector<2x8x1xf32>
    %20 = vector.broadcast %19 : vector<2x8x1xf32> to vector<2x8x8xf32>
    %21 = arith.divf %17, %20 : vector<2x8x8xf32>
    "tpu.trace_start"() <{level = 10 : i32, message = "bqk,bkd->bqd"}> : () -> ()
    %cst_9 = arith.constant dense<0.000000e+00> : vector<2x8x128xf32>
    %22 = tpu.matmul %21, %11, %cst_9 {dimension_numbers = #tpu.dot_dimension_numbers<[2], [1], [1], [2], [0, 0, 0, 1, 1, 2], [0], [0]>} : vector<2x8x8xf32>, vector<2x8x128xf32>, vector<2x8x128xf32> -> vector<2x8x128xf32>
    "tpu.trace_stop"() : () -> ()
    %23 = vector.shape_cast %22 : vector<2x8x128xf32> to vector<16x128xf32>
    %c0_10 = arith.constant 0 : index
    %c0_11 = arith.constant 0 : index
    %24 = vector.load %arg3[%c0_10, %c0_11] : memref<16x128xf32, #tpu.memory_space<vmem>>, vector<16x128xf32>
    tpu.vector_store %arg3[%c0_10, %c0_11], %23 {strides = array<i32>} : memref<16x128xf32, #tpu.memory_space<vmem>>, vector<16x128xf32>,
    return
  }
}

</mosaic_0001>

<bundles_post_ra>
// kernel: tpu_custom_call.1
= control target key start
LH: loop header
LB: loop body
LE: loop exit
PB: predicated region body
PF: predicated region fallthrough
CT: control target
= control target key end

     0   :  { %8 = vsyncpa [#allocation3], 0  ;;  %s769_s0 = inlined_call_operand.hbm [shape: f32[16,32], index: 0, kind: input, shape index: {}]   ;;  %s770_s1 = inlined_call_operand.hbm [shape: f32[32,384], index: 1, kind: input, shape index: {}]   ;;  %s771_s2 = inlined_call_operand.vmem [shape: f32[1,384], index: 2, kind: input, shape index: {}]   ;;  %s772_s3 = inlined_call_operand.hbm [shape: f32[16,128], index: 3, kind: output, shape index: {}]  }
   0x1   :  { %9 = vsyncpa [#allocation6], 0 }
   0x2   :  { %10 = vsyncpa [#allocation4], 0  ;;  %s698_s12 = smov [#allocation2]  }
   0x3   :  { %s16_s13 = sshll.u32 %s698_s12, 4  ;;  %s17_s13 = int_to_ptr.vmem [resolvable:$true] %s16_s13 }
   0x4   :  { %s640_s14 = scalar_lea.vmem %s17_s13, 256  ;;  %p645_p1 = scmp.lt.s32.totalorder %s17_s13, %s17_s13 }
   0x5   :  { %p641_p0 = scmp.ne.s32.totalorder %s17_s13, %s640_s14  ;;  %p646_p2 = scmp.lt.s32.totalorder %s640_s14, %s640_s14 }
   0x7   :  { %p647_p3 = por %p646_p2, %p645_p1 }
   0x9   :  { %p648_p4 = pnand %p647_p3, %p641_p0 }
   0xb   :  { %651 = shalt.err (!%p648_p4)
}
   0xc   :  { %s699_s15 = smov 128   ;;  %s700_s16 = smov 8  }
   0xd   :  { %22 = dma.hbm_to_vmem [thread:$0]  %s769_s0, 256, %s17_s13, [#allocation3], %s699_s15, %s699_s15, %s700_s16  }
   0xe   :  { %s701_s19 = smov [#allocation5]  }
   0xf   :  { %s28_s20 = sshll.u32 %s701_s19, 4  ;;  %s29_s20 = int_to_ptr.vmem [resolvable:$true] %s28_s20 }
  0x10   :  { %s660_s21 = scalar_lea.vmem %s29_s20, 1536  ;;  %p665_p6 = scmp.lt.s32.totalorder %s29_s20, %s29_s20 }
  0x11   :  { %p661_p5 = scmp.ne.s32.totalorder %s29_s20, %s660_s21  ;;  %p666_p7 = scmp.lt.s32.totalorder %s660_s21, %s660_s21 }
  0x13   :  { %p667_p8 = por %p666_p7, %p665_p6 }
  0x15   :  { %p668_p9 = pnand %p667_p8, %p661_p5 }
  0x17   :  { %671 = shalt.err (!%p668_p9)
}
  0x18   :  { %s702_s22 = smov 384   ;;  %s703_s23 = smov 24  }
  0x19   :  { %34 = dma.hbm_to_vmem [thread:$0]  %s770_s1, 1536, %s29_s20, [#allocation6], %s702_s22, %s702_s22, %s703_s23  }
  0x1a   :  { %692 = dma.done.wait [#allocation3], 256  }
  0x1b   :  { %693 = vsyncadd [#allocation3], 4294967040 }
  0x1c   :  { %694 = dma.done.wait [#allocation6], 1536  }
  0x1d   :  { %695 = vsyncadd [#allocation6], 4294965760  ;;  %v704_v0 = vmov 0.0   ;;  %v55_v1 = vld [vmem:[#allocation5 + $0x50] sm:$0xff]  ;;  %v54_v2 = vld [vmem:[#allocation5 + $0x48] sm:$0xff]  ;;  %vm74_vm0 = vcmask 261120   ;;  %v59_v15 = vlaneseq }
  0x1e   :  { %145 = vmatprep.mubr.f32.mxu0 %v704_v0  ;;  %v52_v3 = vld [vmem:[#allocation5 + $0x38] sm:$0xff]  ;;  %105 = vmatprep.subr.mxu0 %v55_v1  ;;  %v51_v4 = vld [vmem:[#allocation5 + $0x30] sm:$0xff]  ;;  %v49_v5 = vld [vmem:[#allocation5 + $0x20] sm:$0xff]  ;;  %vm705_vm1 = vmmov 0   ;;  %vm375_vm2 = vcmask 64512  }
  0x1f   :  { %106 = vmatpush1.msra.mxu0 %v54_v2  ;;  %v43_v6 = vld [vmem:[#allocation2] sm:$0xff]  ;;  %v48_v7 = vld [vmem:[#allocation5 + $0x18] sm:$0xff]  ;;  %v53_v9 = vld [vmem:[#allocation5 + $0x40] sm:$0xff]  ;;  %v60_v16 = vshrl.u32 %v59_v15, 7 }
  0x20   :  { %107 = vmatprep.subr.mxu0 %v52_v3  ;;  %v56_v8 = vld [vmem:[#allocation5 + $0x58] sm:$0xff]  ;;  %592 = vmatprep.mubr.msk.f32.mxu1 %vm74_vm0, %v43_v6  ;;  %v46_v10 = vld [vmem:[#allocation5 + $0x8] sm:$0xff]  ;;  %v45_v11 = vld [vmem:[#allocation5] sm:$0xff] }
  0x21   :  { %108 = vmatpush1.msra.mxu0 %v51_v4  ;;  %584 = vmatprep.subr.mxu1 %v56_v8  ;;  %v44_v12 = vld [vmem:[#allocation2 + $0x8] sm:$0xff]  ;;  %v50_v13 = vld [vmem:[#allocation5 + $0x28] sm:$0xff]  ;;  %v47_v14 = vld [vmem:[#allocation5 + $0x10] sm:$0xff]  ;;  %v69_v17 = vsub.s32 2, %v60_v16  ;;  %v61_v20 = vsub.s32 0, %v60_v16  ;;  %v65_v21 = vsub.s32 1, %v60_v16 }
  0x22   :  { %109 = vmatprep.subr.mxu0 %v49_v5  ;;  %585 = vmatpush3.msra.mxu1 %v56_v8  ;;  %v57_v18 = vld [vmem:[%s771_s2] sm:$0x7]  ;;  %s706_s2 = smov [#allocation7]  }
  0x23   :  { %110 = vmatpush1.msra.mxu0 %v48_v7  ;;  %586 = vmatprep.subr.mxu1 %v53_v9  ;;  %v70_v19 = vrot.slane %v57_v18, %v69_v17  ;;  %v62_v22 = vrot.slane %v57_v18, %v61_v20  ;;  %v66_v23 = vrot.slane %v57_v18, %v65_v21  ;;  %s551_s26 = sshll.u32 %s706_s2, 4  ;;  %s552_s26 = int_to_ptr.vmem [resolvable:$true] %s551_s26 }
  0x24   :  { %111 = vmatprep.subr.mxu0 %v46_v10  ;;  %587 = vmatpush3.msra.mxu1 %v53_v9  ;;  %s672_s27 = scalar_lea.vmem %s552_s26, 256  ;;  %p677_p11 = scmp.lt.s32.totalorder %s552_s26, %s552_s26 }
  0x25   :  { %112 = vmatpush1.msra.mxu0 %v45_v11  ;;  %588 = vmatprep.subr.mxu1 %v50_v13  ;;  %p673_p10 = scmp.ne.s32.totalorder %s552_s26, %s672_s27  ;;  %p678_p12 = scmp.lt.s32.totalorder %s672_s27, %s672_s27 }
  0x26   :  { %564 = vmatmul.mubr.msk.f32.vlgmr.msra.gmra.mxu0 %vm74_vm0, %v43_v6  ;;  %600 = vmatprep.subr.mxu0 %v704_v0 }
  0x27   :  { %151 = vmatprep.mubr.f32.mxu0 %v704_v0  ;;  %589 = vmatpush3.msra.mxu1 %v50_v13  ;;  %p679_p13 = por %p678_p12, %p677_p11 }
  0x28   :  { %590 = vmatprep.subr.mxu1 %v47_v14 }
  0x29   :  { %591 = vmatpush3.msra.mxu1 %v47_v14  ;;  %p680_p0 = pnand %p679_p13, %p673_p10 }
  0x2a   :  { %565 = vmatmul.mubr.msk.f32.gmra.mxu0 %vm74_vm0, %v44_v12  ;;  %593 = vmatmul.mubr.msk.f32.vlgmr.msra.gmra.mxu1 %vm74_vm0, %v44_v12 }
  0x2b   :  { %595 = vmatprep.subr.mxu1 %v704_v0  ;;  %597 = vmatprep.mubr.msk.f32.mxu1 %vm705_vm1, %v704_v0 }
  0x2c   :  { %602 = vmatprep.mubr.msk.f32.mxu0 %vm705_vm1, %v704_v0 }
  0xe6   :  { %v147_v24 = vpop.f32.mrf.mxu0 }
  0xe7   :  { %v148_v25 = vadd.f32 %v147_v24, %v62_v22 }
  0xe8   :  { %v149_v26 = vpop.f32.mrf.mxu0 }
  0xe9   :  { %v150_v27 = vadd.f32 %v149_v26, %v66_v23  ;;  %v233_v29 = vmul.f32 0.03125, %v148_v25 }
  0xea   :  { %v153_v28 = vpop.f32.mrf.mxu0  ;;  %v594_v34 = vpop.f32.mrf.mxu1 }
  0xeb   :  { %596 = vmatpush3.xpose.msra.mxu1 %v150_v27  ;;  %v154_v30 = vadd.f32 %v153_v28, %v62_v22  ;;  %v230_v35 = vadd.f32 %v594_v34, %v70_v19 }
  0xec   :  { %v155_v31 = vpop.f32.mrf.mxu0  ;;  %605 = vmatprep.subr.mxu1 %v704_v0  ;;  %v224_v36 = vpop.f32.mrf.mxu1 }
  0xed   :  { %v156_v32 = vadd.f32 %v155_v31, %v66_v23  ;;  %v234_v33 = vmul.f32 0.03125, %v154_v30  ;;  %v225_v37 = vadd.f32 %v224_v36, %v70_v19 }
  0xee   :  { %598 = vmatmul.mubr.f32.vlgmr.msra.gmra.mxu1 %v233_v29 }
  0xef   :  { %601 = vmatpush3.xpose.msra.mxu0 %v156_v32  ;;  %607 = vmatprep.mubr.msk.f32.mxu1 %vm705_vm1, %v704_v0 }
  0xf0   :  { %610 = vmatprep.subr.mxu0 %v704_v0  ;;  %606 = vmatpush3.msra.mxu1 %v225_v37 }
  0xf2   :  { %603 = vmatmul.mubr.f32.vlgmr.msra.gmra.mxu0 %v234_v33 }
  0xf3   :  { %612 = vmatprep.mubr.msk.f32.mxu0 %vm705_vm1, %v704_v0  ;;  %611 = vmatpush3.msra.mxu0 %v230_v35 }
 0x1ae   :  { %v301_v38 = vpop.f32.mrf.mxu1 }
 0x1af   :  { %v376_v39 = vsel %vm375_vm2, %v301_v38, -inf }
 0x1b0   :  { %377 = vmax.xlane.f32.xlu0 %v376_v39  ;;  %v599_v40 = vpop.f32.mrf.mxu1 }
 0x1b2   :  { %v371_v41 = vpop.f32.mrf.mxu0 }
 0x1b3   :  { %v379_v42 = vsel %vm375_vm2, %v371_v41, -inf }
 0x1b4   :  { %v604_v43 = vpop.f32.mrf.mxu0  ;;  %380 = vmax.xlane.f32.xlu0 %v379_v42 }
 0x239   :  { %v378_v44 = vpop.xlane.xlu0 %377 }
 0x23a   :  { %v382_v45 = vsub.f32 %v301_v38, %v378_v44 }
 0x23c   :  { %v384_v46 = vmul.f32 1.442695, %v382_v45 }
 0x23d   :  { %v381_v47 = vpop.xlane.xlu0 %380 }
 0x23e   :  { %624 = vpow2.f32 %v384_v46  ;;  %v383_v48 = vsub.f32 %v371_v41, %v381_v47 }
 0x240   :  { %v386_v49 = vmul.f32 1.442695, %v383_v48 }
 0x242   :  { %626 = vpow2.f32 %v386_v49 }
 0x24b   :  { %v625_v50 = vpop.eup %624 }
 0x24c   :  { %v388_v51 = vsel %vm375_vm2, %v625_v50, 0.0 }
 0x24d   :  { %389 = vadd.xlane.f32.xlu1 %v388_v51 }
 0x24f   :  { %v627_v52 = vpop.eup %626 }
 0x250   :  { %v391_v53 = vsel %vm375_vm2, %v627_v52, 0.0 }
 0x251   :  { %392 = vadd.xlane.f32.xlu1 %v391_v53 }
 0x2d6   :  { %v390_v54 = vpop.xlane.xlu1 %389 }
 0x2d7   :  { %628 = vrcp.f32 %v390_v54 }
 0x2da   :  { %v393_v55 = vpop.xlane.xlu1 %392 }
 0x2db   :  { %630 = vrcp.f32 %v393_v55 }
 0x2e4   :  { %v629_v56 = vpop.eup %628 }
 0x2e5   :  { %v395_v57 = vmul.f32 %v629_v56, %v625_v50 }
 0x2e7   :  { %608 = vmatmul.mubr.msk.f32.vlgmr.msra.gmra.mxu1 %vm375_vm2, %v395_v57 }
 0x2e8   :  { %v631_v58 = vpop.eup %630 }
 0x2e9   :  { %v397_v59 = vmul.f32 %v631_v58, %v627_v52 }
 0x2eb   :  { %613 = vmatmul.mubr.msk.f32.vlgmr.msra.gmra.mxu0 %vm375_vm2, %v397_v59 }
 0x3a7   :  { %v467_v60 = vpop.f32.mrf.mxu1 }
 0x3a8   :  { %544 = vst [vmem:[#allocation7] sm:$0xff] %v467_v60 }
 0x3a9   :  { %v609_v61 = vpop.f32.mrf.mxu1 }
 0x3ab   :  { %v540_v62 = vpop.f32.mrf.mxu0 }
 0x3ac   :  { %545 = vst [vmem:[#allocation7 + $0x8] sm:$0xff] %v540_v62 }
 0x3ad   :  { %v614_v63 = vpop.f32.mrf.mxu0 }
 0x3ae   :  { %683 = shalt.err (!%p680_p0)
}
 0x3af   :  { %557 = dma.vmem_to_hbm [thread:$0]  %s552_s26, 256, %s772_s3, [#allocation4], %s699_s15, %s699_s15, %s700_s16  }
 0x3b0   :  { %696 = dma.done.wait [#allocation4], 256  }
 0x3b1   :  { %697 = vsyncadd [#allocation4], 4294967040 }
 0x3b2   :  { %561 = vsyncpa [#allocation3], 1 }
 0x3b3   :  { %562 = vsyncpa [#allocation6], 1 }
 0x3b4   :  { %563 = vsyncpa [#allocation4], 1 }

</bundles_post_ra>
